<compile_context>
chip_gen: v7x
topology: tpu7x:2x2x1
jax: 0.10.0
libtpu: 0.0.40
codegen_flags: <defaults>
</compile_context>

<pallas_src>
import functools

import jax
import jax.numpy as jnp
from jax.experimental import pallas as pl
from jax.experimental.pallas import tpu as pltpu


def _round_up(x, m):
    return ((x + m - 1) // m) * m


def _vmem_capacity_bytes():
    try:
        return int(pltpu.get_tpu_info().vmem_capacity_bytes)
    except Exception:
        return 64 << 20  # conservative default (v7x has 64 MiB per TensorCore)


def _compiler_params(dimension_semantics, vmem_need, vmem_cap):
    kwargs = {"dimension_semantics": dimension_semantics}
    budget = 2 * vmem_need
    if budget > (16 << 20):          # only raise above the default scoped limit
        kwargs["vmem_limit_bytes"] = int(min(budget, 0.7 * vmem_cap))
    return pltpu.CompilerParams(**kwargs)


# --------------------------- Kernel 1 ----------------------------------------

def _gather_mean_resident_kernel(ids_ref, emb_ref, out_ref, *, tile_b, c_len, inv_c):
    """grid=(B_pad//tile_b,). Embedding table resident in VMEM; ids in SMEM."""
    bt = pl.program_id(0)
    e = emb_ref.shape[1]
    base = bt * tile_b * c_len
    for r in range(tile_b):                       # static unroll over the batch tile
        def cbody(c, acc):
            idx = ids_ref[base + r * c_len + c]
            return acc + emb_ref[pl.ds(idx, 1), :].astype(jnp.float32)

        acc = jax.lax.fori_loop(0, c_len, cbody, jnp.zeros((1, e), jnp.float32))
        out_ref[pl.ds(r, 1), :] = (acc * inv_c).astype(out_ref.dtype)


def _gather_mean_hbm_kernel(ids_ref, emb_hbm, out_ref, row_buf, sem,
                            *, tile_b, c_len, inv_c):
    """grid=(B_pad//tile_b,). Table stays in HBM; rows fetched with double-buffered
    async copies driven by the SMEM-prefetched ids."""
    bt = pl.program_id(0)
    e = emb_hbm.shape[1]
    n = tile_b * c_len
    base = bt * n

    def start_fetch(i, slot):
        idx = ids_ref[base + i]
        pltpu.make_async_copy(emb_hbm.at[pl.ds(idx, 1), :],
                              row_buf.at[slot], sem.at[slot]).start()

    start_fetch(0, 0)

    def body(i, acc):
        slot = i % 2
        pltpu.make_async_copy(emb_hbm.at[pl.ds(0, 1), :],
                              row_buf.at[slot], sem.at[slot]).wait()

        @pl.when(i + 1 < n)
        def _():
            start_fetch(i + 1, 1 - slot)

        acc = acc + row_buf[slot].astype(jnp.float32)
        r = i // c_len
        done = (i % c_len) == c_len - 1

        @pl.when(done)
        def _():
            out_ref[pl.ds(r, 1), :] = (acc * inv_c).astype(out_ref.dtype)

        return jnp.where(done, jnp.zeros_like(acc), acc)

    jax.lax.fori_loop(0, n, body, jnp.zeros((1, e), jnp.float32))


# --------------------------- Kernel 2 ----------------------------------------

def _projection_kernel(mean_ref, w_ref, b_ref, out_ref):
    """grid=(V_pad//tv, B_pad//tm). out_tile = mean_tile @ w_tile.T + bias_tile."""
    out_ref[...] = (jax.lax.dot_general(
        mean_ref[...], w_ref[...],
        dimension_numbers=(((1,), (1,)), ((), ())),
        preferred_element_type=jnp.float32,
    ) + b_ref[...]).astype(out_ref.dtype)


# --------------------------- Wrapper ------------------------------------------

def word2vec_forward(context_words, emb_table, lin_weight, lin_bias, *,
                     tile_v=1024, weight_dtype=None, force_hbm_gather=False):
    """context_words: (B, C) int; emb_table: (V, E); lin_weight: (V, E); lin_bias: (V,).

    Returns logits (B, V) float32.  Dropout is identity (eval-mode semantics).
    weight_dtype=jnp.bfloat16 halves HBM traffic of the bandwidth-bound projection
    (cast once here, outside the kernel); accumulation stays float32.  emb_table may
    likewise be passed pre-cast to bf16; the gather kernels accumulate in float32.
    """
    B, C = context_words.shape
    V, E = emb_table.shape
    vmem_cap = _vmem_capacity_bytes()

    # ---- batch padding / tiling (shared by both kernels) ----
    tile_b = 8                                   # sublane-dense gather/mean tile
    B_pad = _round_up(B, tile_b)
    if B_pad > 128:                              # cap kernel-2 VMEM, fill MXU rows
        tm = 128
        B_pad = _round_up(B_pad, tm)
    else:
        tm = B_pad

    ids_flat = context_words.reshape(-1).astype(jnp.int32)
    if B_pad != B:                               # pad rows gather row 0; sliced off below
        ids_flat = jnp.pad(ids_flat, (0, (B_pad - B) * C))

    # ---------------- Kernel 1: embedding gather + context mean ----------------
    table_bytes = V * E * emb_table.dtype.itemsize
    resident = (not force_hbm_gather) and (table_bytes <= vmem_cap // 8)
    inv_c = 1.0 / C

    if resident:
        need1 = 2 * table_bytes + 2 * tile_b * E * 4
        mean_emb = pl.pallas_call(
            functools.partial(_gather_mean_resident_kernel,
                              tile_b=tile_b, c_len=C, inv_c=inv_c),
            out_shape=jax.ShapeDtypeStruct((B_pad, E), jnp.float32),
            grid_spec=pltpu.PrefetchScalarGridSpec(
                num_scalar_prefetch=1,
                grid=(B_pad // tile_b,),
                in_specs=[pl.BlockSpec((V, E), lambda b, ids: (0, 0))],
                out_specs=pl.BlockSpec((tile_b, E), lambda b, ids: (b, 0)),
            ),
            compiler_params=_compiler_params(("parallel",), need1, vmem_cap),
        )(ids_flat, emb_table)
    else:
        need1 = 4 * E * emb_table.dtype.itemsize + 2 * tile_b * E * 4
        mean_emb = pl.pallas_call(
            functools.partial(_gather_mean_hbm_kernel,
                              tile_b=tile_b, c_len=C, inv_c=inv_c),
            out_shape=jax.ShapeDtypeStruct((B_pad, E), jnp.float32),
            grid_spec=pltpu.PrefetchScalarGridSpec(
                num_scalar_prefetch=1,
                grid=(B_pad // tile_b,),
                in_specs=[pl.BlockSpec(memory_space=pl.ANY)],
                out_specs=pl.BlockSpec((tile_b, E), lambda b, ids: (b, 0)),
                scratch_shapes=[
                    pltpu.VMEM((2, 1, E), emb_table.dtype),
                    pltpu.SemaphoreType.DMA((2,)),
                ],
            ),
            compiler_params=_compiler_params(("parallel",), need1, vmem_cap),
        )(ids_flat, emb_table)

    # TODO(synk): train-mode dropout (pltpu.prng_seed + prng_random_bits mask on
    # mean_emb) is not wired in; this matches nn.Dropout in eval() mode.

    # ---------------- Kernel 2: vocab- and batch-tiled projection ----------------
    if weight_dtype is not None and lin_weight.dtype != weight_dtype:
        lin_weight = lin_weight.astype(weight_dtype)     # one-time cast, outside kernel
    mean_in = (mean_emb.astype(lin_weight.dtype)
               if lin_weight.dtype != jnp.float32 else mean_emb)

    # Lane-dense vocab tiles: descending candidates; never the whole-V fallback.
    V_pad = _round_up(V, 128)
    tv = 128
    for cand in (tile_v, 2048, 1024, 512, 256, 128):
        if cand and cand % 128 == 0 and cand <= V_pad and V_pad % cand == 0:
            tv = cand
            break
    # Keep the "parallel" vocab-tile count even so v7x's two TensorCores stay balanced.
    if (V_pad // tv) % 2 == 1 and (V_pad // tv) > 1 and tv % 256 == 0:
        tv //= 2

    if V_pad != V:
        lin_weight = jnp.pad(lin_weight, ((0, V_pad - V), (0, 0)))
        lin_bias = jnp.pad(lin_bias, (0, V_pad - V))
    bias2 = lin_bias.reshape(1, V_pad).astype(jnp.float32)

    need2 = 2 * (tm * E * mean_in.dtype.itemsize
                 + tv * E * lin_weight.dtype.itemsize
                 + tv * 4 + tm * tv * 4)

    out_padded = pl.pallas_call(
        _projection_kernel,
        out_shape=jax.ShapeDtypeStruct((B_pad, V_pad), jnp.float32),
        grid=(V_pad // tv, B_pad // tm),
        in_specs=[
            pl.BlockSpec((tm, E), lambda j, m: (m, 0)),   # mean tile
            pl.BlockSpec((tv, E), lambda j, m: (j, 0)),   # weight tile: resident over inner m
            pl.BlockSpec((1, tv), lambda j, m: (0, j)),   # bias tile
        ],
        out_specs=pl.BlockSpec((tm, tv), lambda j, m: (m, j)),
        compiler_params=_compiler_params(("parallel", "parallel"), need2, vmem_cap),
    )(mean_in, lin_weight, bias2)

    return out_padded[:B, :V]


if __name__ == "__main__":
    # Small, deterministic setup consistent with the module's __init__.
    vocab_size, embedding_dim = 128, 32
    batch, context_len = 2, 8

    key = jax.random.PRNGKey(0)
    k_ids, k_emb, k_w, k_b = jax.random.split(key, 4)

    context_words = jax.random.randint(
        k_ids, (batch, context_len), 0, vocab_size, dtype=jnp.int32)

    # nn.Embedding default init: N(0, 1)
    emb_table = jax.random.normal(k_emb, (vocab_size, embedding_dim), jnp.float32)
    # nn.Linear default init: U(-1/sqrt(in), 1/sqrt(in))
    bound = 1.0 / (embedding_dim ** 0.5)
    lin_weight = jax.random.uniform(
        k_w, (vocab_size, embedding_dim), jnp.float32, -bound, bound)
    lin_bias = jax.random.uniform(k_b, (vocab_size,), jnp.float32, -bound, bound)

    # Pure-JAX reference (eval-mode dropout = identity)
    ref = jnp.take(emb_table, context_words, axis=0).mean(axis=1) @ lin_weight.T + lin_bias

    # 1) default path: VMEM-resident embedding table, f32 weights (exact semantics)
    out = jax.block_until_ready(
        word2vec_forward(context_words, emb_table, lin_weight, lin_bias))
    assert out.shape == (batch, vocab_size)
    assert jnp.allclose(out, ref, atol=1e-4, rtol=1e-4)

    # 2) large-table fallback: double-buffered HBM row-gather path
    out_hbm = jax.block_until_ready(
        word2vec_forward(context_words, emb_table, lin_weight, lin_bias,
                         force_hbm_gather=True))
    assert jnp.allclose(out_hbm, ref, atol=1e-4, rtol=1e-4)

    # 3) bf16 weight streaming for the HBM-bandwidth-bound projection (f32 accumulation)
    out_bf16 = jax.block_until_ready(
        word2vec_forward(context_words, emb_table, lin_weight, lin_bias,
                         weight_dtype=jnp.bfloat16))
    assert jnp.allclose(out_bf16, ref, atol=3e-2, rtol=3e-2)

    print("KERNEL_OK")
</pallas_src>

<mosaic_0001>
module attributes {stable_mosaic.version = 11 : i64} {
  func.func @_gather_mean_resident_kernel(%arg0: i32, %arg1: memref<64xi32, #tpu.memory_space<smem>>, %arg2: memref<128x32xf32, #tpu.memory_space<vmem>>, %arg3: memref<8x32xf32, #tpu.memory_space<vmem>>) attributes {dimension_semantics = [#tpu.dimension_semantics<parallel>], iteration_bounds = array<i64: 1>, scalar_prefetch = 1 : i64, scratch_operands = 0 : i64, tpu.core_type = #tpu.core_type<tc>, window_params = [{pipeline_mode = #tpu.pipeline_mode<synchronous>, transform_indices = @transform_0, window_bounds = array<i64: 128, 32>}, {transform_indices = @transform_1, window_bounds = array<i64: 8, 32>}]} {
    %c8_i32 = arith.constant 8 : i32
    %0 = arith.muli %arg0, %c8_i32 : i32
    %c8_i32_0 = arith.constant 8 : i32
    %1 = arith.muli %0, %c8_i32_0 : i32
    %cst = arith.constant 0.000000e+00 : f32
    %2 = vector.broadcast %cst : f32 to vector<1x32xf32>
    %c0_i32 = arith.constant 0 : i32
    %c8_i32_1 = arith.constant 8 : i32
    %3 = arith.addi %c0_i32, %c8_i32_1 : i32
    %c1_i32 = arith.constant 1 : i32
    %4 = scf.for %arg4 = %c0_i32 to %3 step %c1_i32 iter_args(%arg5 = %2) -> (vector<1x32xf32>)  : i32 {
      %c0_i32_54 = arith.constant 0 : i32
      %50 = arith.addi %1, %c0_i32_54 : i32
      %51 = arith.addi %50, %arg4 : i32
      %52 = arith.index_cast %51 : i32 to index
      %53 = memref.load %arg1[%52] : memref<64xi32, #tpu.memory_space<smem>>
      %54 = arith.index_cast %53 : i32 to index
      %c0_55 = arith.constant 0 : index
      %55 = vector.load %arg2[%54, %c0_55] : memref<128x32xf32, #tpu.memory_space<vmem>>, vector<1x32xf32>
      %56 = arith.addf %arg5, %55 : vector<1x32xf32>
      scf.yield %56 : vector<1x32xf32>
    }
    %c8_i32_2 = arith.constant 8 : i32
    %cst_3 = arith.constant 1.250000e-01 : f32
    %5 = vector.broadcast %cst_3 : f32 to vector<1x32xf32>
    %6 = arith.mulf %4, %5 : vector<1x32xf32>
    %c0 = arith.constant 0 : index
    %c0_4 = arith.constant 0 : index
    %7 = vector.load %arg3[%c0, %c0_4] : memref<8x32xf32, #tpu.memory_space<vmem>>, vector<1x32xf32>
    tpu.vector_store %arg3[%c0, %c0_4], %6 {strides = array<i32>} : memref<8x32xf32, #tpu.memory_space<vmem>>, vector<1x32xf32>,
    %cst_5 = arith.constant 0.000000e+00 : f32
    %8 = vector.broadcast %cst_5 : f32 to vector<1x32xf32>
    %c0_i32_6 = arith.constant 0 : i32
    %c8_i32_7 = arith.constant 8 : i32
    %9 = arith.addi %c0_i32_6, %c8_i32_7 : i32
    %c1_i32_8 = arith.constant 1 : i32
    %10 = scf.for %arg4 = %c0_i32_6 to %9 step %c1_i32_8 iter_args(%arg5 = %8) -> (vector<1x32xf32>)  : i32 {
      %c8_i32_54 = arith.constant 8 : i32
      %50 = arith.addi %1, %c8_i32_54 : i32
      %51 = arith.addi %50, %arg4 : i32
      %52 = arith.index_cast %51 : i32 to index
      %53 = memref.load %arg1[%52] : memref<64xi32, #tpu.memory_space<smem>>
      %54 = arith.index_cast %53 : i32 to index
      %c0_55 = arith.constant 0 : index
      %55 = vector.load %arg2[%54, %c0_55] : memref<128x32xf32, #tpu.memory_space<vmem>>, vector<1x32xf32>
      %56 = arith.addf %arg5, %55 : vector<1x32xf32>
      scf.yield %56 : vector<1x32xf32>
    }
    %c8_i32_9 = arith.constant 8 : i32
    %cst_10 = arith.constant 1.250000e-01 : f32
    %11 = vector.broadcast %cst_10 : f32 to vector<1x32xf32>
    %12 = arith.mulf %10, %11 : vector<1x32xf32>
    %c1 = arith.constant 1 : index
    %c0_11 = arith.constant 0 : index
    %13 = vector.load %arg3[%c1, %c0_11] : memref<8x32xf32, #tpu.memory_space<vmem>>, vector<1x32xf32>
    tpu.vector_store %arg3[%c1, %c0_11], %12 {strides = array<i32>} : memref<8x32xf32, #tpu.memory_space<vmem>>, vector<1x32xf32>,
    %cst_12 = arith.constant 0.000000e+00 : f32
    %14 = vector.broadcast %cst_12 : f32 to vector<1x32xf32>
    %c0_i32_13 = arith.constant 0 : i32
    %c8_i32_14 = arith.constant 8 : i32
    %15 = arith.addi %c0_i32_13, %c8_i32_14 : i32
    %c1_i32_15 = arith.constant 1 : i32
    %16 = scf.for %arg4 = %c0_i32_13 to %15 step %c1_i32_15 iter_args(%arg5 = %14) -> (vector<1x32xf32>)  : i32 {
      %c16_i32 = arith.constant 16 : i32
      %50 = arith.addi %1, %c16_i32 : i32
      %51 = arith.addi %50, %arg4 : i32
      %52 = arith.index_cast %51 : i32 to index
      %53 = memref.load %arg1[%52] : memref<64xi32, #tpu.memory_space<smem>>
      %54 = arith.index_cast %53 : i32 to index
      %c0_54 = arith.constant 0 : index
      %55 = vector.load %arg2[%54, %c0_54] : memref<128x32xf32, #tpu.memory_space<vmem>>, vector<1x32xf32>
      %56 = arith.addf %arg5, %55 : vector<1x32xf32>
      scf.yield %56 : vector<1x32xf32>
    }
    %c8_i32_16 = arith.constant 8 : i32
    %cst_17 = arith.constant 1.250000e-01 : f32
    %17 = vector.broadcast %cst_17 : f32 to vector<1x32xf32>
    %18 = arith.mulf %16, %17 : vector<1x32xf32>
    %c2 = arith.constant 2 : index
    %c0_18 = arith.constant 0 : index
    %19 = vector.load %arg3[%c2, %c0_18] : memref<8x32xf32, #tpu.memory_space<vmem>>, vector<1x32xf32>
    tpu.vector_store %arg3[%c2, %c0_18], %18 {strides = array<i32>} : memref<8x32xf32, #tpu.memory_space<vmem>>, vector<1x32xf32>,
    %cst_19 = arith.constant 0.000000e+00 : f32
    %20 = vector.broadcast %cst_19 : f32 to vector<1x32xf32>
    %c0_i32_20 = arith.constant 0 : i32
    %c8_i32_21 = arith.constant 8 : i32
    %21 = arith.addi %c0_i32_20, %c8_i32_21 : i32
    %c1_i32_22 = arith.constant 1 : i32
    %22 = scf.for %arg4 = %c0_i32_20 to %21 step %c1_i32_22 iter_args(%arg5 = %20) -> (vector<1x32xf32>)  : i32 {
      %c24_i32 = arith.constant 24 : i32
      %50 = arith.addi %1, %c24_i32 : i32
      %51 = arith.addi %50, %arg4 : i32
      %52 = arith.index_cast %51 : i32 to index
      %53 = memref.load %arg1[%52] : memref<64xi32, #tpu.memory_space<smem>>
      %54 = arith.index_cast %53 : i32 to index
      %c0_54 = arith.constant 0 : index
      %55 = vector.load %arg2[%54, %c0_54] : memref<128x32xf32, #tpu.memory_space<vmem>>, vector<1x32xf32>
      %56 = arith.addf %arg5, %55 : vector<1x32xf32>
      scf.yield %56 : vector<1x32xf32>
    }
    %c8_i32_23 = arith.constant 8 : i32
    %cst_24 = arith.constant 1.250000e-01 : f32
    %23 = vector.broadcast %cst_24 : f32 to vector<1x32xf32>
    %24 = arith.mulf %22, %23 : vector<1x32xf32>
    %c3 = arith.constant 3 : index
    %c0_25 = arith.constant 0 : index
    %25 = vector.load %arg3[%c3, %c0_25] : memref<8x32xf32, #tpu.memory_space<vmem>>, vector<1x32xf32>
    tpu.vector_store %arg3[%c3, %c0_25], %24 {strides = array<i32>} : memref<8x32xf32, #tpu.memory_space<vmem>>, vector<1x32xf32>,
    %cst_26 = arith.constant 0.000000e+00 : f32
    %26 = vector.broadcast %cst_26 : f32 to vector<1x32xf32>
    %c0_i32_27 = arith.constant 0 : i32
    %c8_i32_28 = arith.constant 8 : i32
    %27 = arith.addi %c0_i32_27, %c8_i32_28 : i32
    %c1_i32_29 = arith.constant 1 : i32
    %28 = scf.for %arg4 = %c0_i32_27 to %27 step %c1_i32_29 iter_args(%arg5 = %26) -> (vector<1x32xf32>)  : i32 {
      %c32_i32 = arith.constant 32 : i32
      %50 = arith.addi %1, %c32_i32 : i32
      %51 = arith.addi %50, %arg4 : i32
      %52 = arith.index_cast %51 : i32 to index
      %53 = memref.load %arg1[%52] : memref<64xi32, #tpu.memory_space<smem>>
      %54 = arith.index_cast %53 : i32 to index
      %c0_54 = arith.constant 0 : index
      %55 = vector.load %arg2[%54, %c0_54] : memref<128x32xf32, #tpu.memory_space<vmem>>, vector<1x32xf32>
      %56 = arith.addf %arg5, %55 : vector<1x32xf32>
      scf.yield %56 : vector<1x32xf32>
    }
    %c8_i32_30 = arith.constant 8 : i32
    %cst_31 = arith.constant 1.250000e-01 : f32
    %29 = vector.broadcast %cst_31 : f32 to vector<1x32xf32>
    %30 = arith.mulf %28, %29 : vector<1x32xf32>
    %c4 = arith.constant 4 : index
    %c0_32 = arith.constant 0 : index
    %31 = vector.load %arg3[%c4, %c0_32] : memref<8x32xf32, #tpu.memory_space<vmem>>, vector<1x32xf32>
    tpu.vector_store %arg3[%c4, %c0_32], %30 {strides = array<i32>} : memref<8x32xf32, #tpu.memory_space<vmem>>, vector<1x32xf32>,
    %cst_33 = arith.constant 0.000000e+00 : f32
    %32 = vector.broadcast %cst_33 : f32 to vector<1x32xf32>
    %c0_i32_34 = arith.constant 0 : i32
    %c8_i32_35 = arith.constant 8 : i32
    %33 = arith.addi %c0_i32_34, %c8_i32_35 : i32
    %c1_i32_36 = arith.constant 1 : i32
    %34 = scf.for %arg4 = %c0_i32_34 to %33 step %c1_i32_36 iter_args(%arg5 = %32) -> (vector<1x32xf32>)  : i32 {
      %c40_i32 = arith.constant 40 : i32
      %50 = arith.addi %1, %c40_i32 : i32
      %51 = arith.addi %50, %arg4 : i32
      %52 = arith.index_cast %51 : i32 to index
      %53 = memref.load %arg1[%52] : memref<64xi32, #tpu.memory_space<smem>>
      %54 = arith.index_cast %53 : i32 to index
      %c0_54 = arith.constant 0 : index
      %55 = vector.load %arg2[%54, %c0_54] : memref<128x32xf32, #tpu.memory_space<vmem>>, vector<1x32xf32>
      %56 = arith.addf %arg5, %55 : vector<1x32xf32>
      scf.yield %56 : vector<1x32xf32>
    }
    %c8_i32_37 = arith.constant 8 : i32
    %cst_38 = arith.constant 1.250000e-01 : f32
    %35 = vector.broadcast %cst_38 : f32 to vector<1x32xf32>
    %36 = arith.mulf %34, %35 : vector<1x32xf32>
    %c5 = arith.constant 5 : index
    %c0_39 = arith.constant 0 : index
    %37 = vector.load %arg3[%c5, %c0_39] : memref<8x32xf32, #tpu.memory_space<vmem>>, vector<1x32xf32>
    tpu.vector_store %arg3[%c5, %c0_39], %36 {strides = array<i32>} : memref<8x32xf32, #tpu.memory_space<vmem>>, vector<1x32xf32>,
    %cst_40 = arith.constant 0.000000e+00 : f32
    %38 = vector.broadcast %cst_40 : f32 to vector<1x32xf32>
    %c0_i32_41 = arith.constant 0 : i32
    %c8_i32_42 = arith.constant 8 : i32
    %39 = arith.addi %c0_i32_41, %c8_i32_42 : i32
    %c1_i32_43 = arith.constant 1 : i32
    %40 = scf.for %arg4 = %c0_i32_41 to %39 step %c1_i32_43 iter_args(%arg5 = %38) -> (vector<1x32xf32>)  : i32 {
      %c48_i32 = arith.constant 48 : i32
      %50 = arith.addi %1, %c48_i32 : i32
      %51 = arith.addi %50, %arg4 : i32
      %52 = arith.index_cast %51 : i32 to index
      %53 = memref.load %arg1[%52] : memref<64xi32, #tpu.memory_space<smem>>
      %54 = arith.index_cast %53 : i32 to index
      %c0_54 = arith.constant 0 : index
      %55 = vector.load %arg2[%54, %c0_54] : memref<128x32xf32, #tpu.memory_space<vmem>>, vector<1x32xf32>
      %56 = arith.addf %arg5, %55 : vector<1x32xf32>
      scf.yield %56 : vector<1x32xf32>
    }
    %c8_i32_44 = arith.constant 8 : i32
    %cst_45 = arith.constant 1.250000e-01 : f32
    %41 = vector.broadcast %cst_45 : f32 to vector<1x32xf32>
    %42 = arith.mulf %40, %41 : vector<1x32xf32>
    %c6 = arith.constant 6 : index
    %c0_46 = arith.constant 0 : index
    %43 = vector.load %arg3[%c6, %c0_46] : memref<8x32xf32, #tpu.memory_space<vmem>>, vector<1x32xf32>
    tpu.vector_store %arg3[%c6, %c0_46], %42 {strides = array<i32>} : memref<8x32xf32, #tpu.memory_space<vmem>>, vector<1x32xf32>,
    %cst_47 = arith.constant 0.000000e+00 : f32
    %44 = vector.broadcast %cst_47 : f32 to vector<1x32xf32>
    %c0_i32_48 = arith.constant 0 : i32
    %c8_i32_49 = arith.constant 8 : i32
    %45 = arith.addi %c0_i32_48, %c8_i32_49 : i32
    %c1_i32_50 = arith.constant 1 : i32
    %46 = scf.for %arg4 = %c0_i32_48 to %45 step %c1_i32_50 iter_args(%arg5 = %44) -> (vector<1x32xf32>)  : i32 {
      %c56_i32 = arith.constant 56 : i32
      %50 = arith.addi %1, %c56_i32 : i32
      %51 = arith.addi %50, %arg4 : i32
      %52 = arith.index_cast %51 : i32 to index
      %53 = memref.load %arg1[%52] : memref<64xi32, #tpu.memory_space<smem>>
      %54 = arith.index_cast %53 : i32 to index
      %c0_54 = arith.constant 0 : index
      %55 = vector.load %arg2[%54, %c0_54] : memref<128x32xf32, #tpu.memory_space<vmem>>, vector<1x32xf32>
      %56 = arith.addf %arg5, %55 : vector<1x32xf32>
      scf.yield %56 : vector<1x32xf32>
    }
    %c8_i32_51 = arith.constant 8 : i32
    %cst_52 = arith.constant 1.250000e-01 : f32
    %47 = vector.broadcast %cst_52 : f32 to vector<1x32xf32>
    %48 = arith.mulf %46, %47 : vector<1x32xf32>
    %c7 = arith.constant 7 : index
    %c0_53 = arith.constant 0 : index
    %49 = vector.load %arg3[%c7, %c0_53] : memref<8x32xf32, #tpu.memory_space<vmem>>, vector<1x32xf32>
    tpu.vector_store %arg3[%c7, %c0_53], %48 {strides = array<i32>} : memref<8x32xf32, #tpu.memory_space<vmem>>, vector<1x32xf32>,
    return
  }
  func.func @transform_0(%arg0: i32, %arg1: memref<64xi32, #tpu.memory_space<smem>>) -> (i32, i32) {
    %c0_i32 = arith.constant 0 : i32
    %c0_i32_0 = arith.constant 0 : i32
    %c0_i32_1 = arith.constant 0 : i32
    return %c0_i32, %c0_i32_0 : i32, i32
  }
  func.func @transform_1(%arg0: i32, %arg1: memref<64xi32, #tpu.memory_space<smem>>) -> (i32, i32) {
    %c0_i32 = arith.constant 0 : i32
    %c0_i32_0 = arith.constant 0 : i32
    return %arg0, %c0_i32 : i32, i32
  }
}

</mosaic_0001>

<bundles_post_ra>
// kernel: tpu_custom_call.1
= control target key start
LH: loop header
LB: loop body
LE: loop exit
PB: predicated region body
PF: predicated region fallthrough
CT: control target
= control target key end

     0   :  { %s583_s0 = inlined_call_operand.vmem [shape: s32[64], index: 0, kind: input, shape index: {}]   ;;  %s584_s1 = inlined_call_operand.vmem [shape: f32[128,32], index: 1, kind: input, shape index: {}]   ;;  %s585_s2 = inlined_call_operand.hbm [shape: f32[8,32], index: 2, kind: output, shape index: {}]  }
   0x1   :  { %s7_s11 = sshll.u32 %s583_s0, 4  ;;  %s8_s11 = int_to_ptr.vmem [resolvable:$true] %s7_s11 }
   0x2   :  { %s353_s12 = scalar_lea.vmem %s8_s11, 16  ;;  %p358_p1 = scmp.lt.s32.totalorder %s8_s11, %s8_s11 }
   0x3   :  { %p354_p0 = scmp.ne.s32.totalorder %s8_s11, %s353_s12  ;;  %p359_p2 = scmp.lt.s32.totalorder %s353_s12, %s353_s12 }
   0x5   :  { %p360_p3 = por %p359_p2, %p358_p1 }
   0x7   :  { %p361_p4 = pnand %p360_p3, %p354_p0 }
   0x9   :  { %364 = shalt.err (!%p361_p4)  }
   0xa   :  { %s519_s13 = smov [#allocation3]  }
   0xb   :  { %10 = dma.vmem_to_smem %s8_s11, 16, %s519_s13, [#allocation2] }
   0xc   :  { %451 = dma.done.wait [#allocation2], 16 }
   0xd   :  { %452 = vsyncadd [#allocation2], 4294967280 }
   0xe   :  { %12 = sfence }
   0xf   :  { %13 = vsyncpa [#allocation5], 0  ;;  %v455_v0 = vmov 0.0   ;;  %s459_s14 = smov 0  }
  0x10 LB: > { %s25_s0 = sld [smem:[#allocation3 + %s461_s14]]  ;;  %s22_s14 = sadd.s32 1, %s461_s14   ;;  %s461_s14 = sphi %s459_s14, %s22_s14   ;;  %v457_v0 = vphi %v455_v0, %v456_v0  }
  0x11   : > { %p19_p5 = scmp.ge.s32.totalorder %s22_s14, 8  }
  0x12   :  { %vm30_vm0 = vcmask (%p19_p5), 253952   ;;  %v463_v4 = vmov (%p19_p5), 0.0   ;;  %s467_s18 = smov (%p19_p5), 0  }
  0x14   :  { %21 = sbr.rel (!%p19_p5) target bundleno = 16 (0x10), region = 88 }
  0x16   : > { %s26_s17 = scalar_lea.vmem %s584_s1, %s25_s0 }
  0x17   : > { %v27_v1 = vld [vmem:[%s26_s17] sm:$0x1] }
  0x18   : > { %v28_v2 = vadd.f32 %v457_v0, %v27_v1  }
  0x1a   : > { %v456_v0 = vmov %v28_v2   ;;  %v29_v3 = vmul.f32 (%p19_p5), 0.125, %v28_v2 }
  0x1c   :  { %31 = vst.msk [vmem:[#allocation4] sm:$0x1] %vm30_vm0, %v29_v3 }
  0x1d LB: > { %s40_s19 = sadd.s32 8, %s469_s18  ;;  %s37_s18 = sadd.s32 1, %s469_s18   ;;  %s469_s18 = sphi %s467_s18, %s37_s18   ;;  %v465_v4 = vphi %v463_v4, %v464_v4  }
  0x1e   : > { %s41_s20 = sld [smem:[#allocation3 + %s40_s19]]  ;;  %p34_p6 = scmp.ge.s32.totalorder %s37_s18, 8  }
  0x1f   :  { %v471_v8 = vmov (%p34_p6), 0.0   ;;  %s475_s24 = smov (%p34_p6), 0  }
  0x22   :  { %36 = sbr.rel (!%p34_p6) target bundleno = 29 (0x1d), region = 99 }
  0x24   : > { %s42_s23 = scalar_lea.vmem %s584_s1, %s41_s20 }
  0x25   : > { %v43_v5 = vld [vmem:[%s42_s23] sm:$0x1] }
  0x26   : > { %v44_v6 = vadd.f32 %v465_v4, %v43_v5  }
  0x28   : > { %v464_v4 = vmov %v44_v6   ;;  %v45_v7 = vmul.f32 (%p34_p6), 0.125, %v44_v6 }
  0x2a   :  { %46 = vst.msk [vmem:[#allocation4 + $0x1] sm:$0x1] %vm30_vm0, %v45_v7 }
  0x2b LB: > { %s55_s25 = sadd.s32 16, %s477_s24  ;;  %s52_s24 = sadd.s32 1, %s477_s24   ;;  %s477_s24 = sphi %s475_s24, %s52_s24   ;;  %v473_v8 = vphi %v471_v8, %v472_v8  }
  0x2c   : > { %s56_s26 = sld [smem:[#allocation3 + %s55_s25]]  ;;  %p49_p7 = scmp.ge.s32.totalorder %s52_s24, 8  }
  0x2d   :  { %v479_v12 = vmov (%p49_p7), 0.0   ;;  %s483_s30 = smov (%p49_p7), 0  }
  0x30   :  { %51 = sbr.rel (!%p49_p7) target bundleno = 43 (0x2b), region = 110 }
  0x32   : > { %s57_s29 = scalar_lea.vmem %s584_s1, %s56_s26 }
  0x33   : > { %v58_v9 = vld [vmem:[%s57_s29] sm:$0x1] }
  0x34   : > { %v59_v10 = vadd.f32 %v473_v8, %v58_v9  }
  0x36   : > { %v472_v8 = vmov %v59_v10   ;;  %v60_v11 = vmul.f32 (%p49_p7), 0.125, %v59_v10 }
  0x38   :  { %61 = vst.msk [vmem:[#allocation4 + $0x2] sm:$0x1] %vm30_vm0, %v60_v11 }
  0x39 LB: > { %s70_s3 = sadd.s32 24, %s485_s30  ;;  %s67_s30 = sadd.s32 1, %s485_s30   ;;  %s485_s30 = sphi %s483_s30, %s67_s30   ;;  %v481_v12 = vphi %v479_v12, %v480_v12  }
  0x3a   : > { %s71_s4 = sld [smem:[#allocation3 + %s70_s3]]  ;;  %p64_p8 = scmp.ge.s32.totalorder %s67_s30, 8  }
  0x3b   :  { %v487_v16 = vmov (%p64_p8), 0.0   ;;  %s491_s8 = smov (%p64_p8), 0  }
  0x3e   :  { %66 = sbr.rel (!%p64_p8) target bundleno = 57 (0x39), region = 121 }
  0x40   : > { %s72_s7 = scalar_lea.vmem %s584_s1, %s71_s4 }
  0x41   : > { %v73_v13 = vld [vmem:[%s72_s7] sm:$0x1] }
  0x42   : > { %v74_v14 = vadd.f32 %v481_v12, %v73_v13  }
  0x44   : > { %v480_v12 = vmov %v74_v14   ;;  %v75_v15 = vmul.f32 (%p64_p8), 0.125, %v74_v14 }
  0x46   :  { %76 = vst.msk [vmem:[#allocation4 + $0x3] sm:$0x1] %vm30_vm0, %v75_v15 }
  0x47 LB: > { %s85_s9 = sadd.s32 32, %s493_s8  ;;  %s82_s8 = sadd.s32 1, %s493_s8   ;;  %s493_s8 = sphi %s491_s8, %s82_s8   ;;  %v489_v16 = vphi %v487_v16, %v488_v16  }
  0x48   : > { %s86_s10 = sld [smem:[#allocation3 + %s85_s9]]  ;;  %p79_p9 = scmp.ge.s32.totalorder %s82_s8, 8  }
  0x49   :  { %v495_v20 = vmov (%p79_p9), 0.0   ;;  %s499_s14 = smov (%p79_p9), 0  }
  0x4c   :  { %81 = sbr.rel (!%p79_p9) target bundleno = 71 (0x47), region = 132 }
  0x4e   : > { %s87_s13 = scalar_lea.vmem %s584_s1, %s86_s10 }
  0x4f   : > { %v88_v17 = vld [vmem:[%s87_s13] sm:$0x1] }
  0x50   : > { %v89_v18 = vadd.f32 %v489_v16, %v88_v17  }
  0x52   : > { %v488_v16 = vmov %v89_v18   ;;  %v90_v19 = vmul.f32 (%p79_p9), 0.125, %v89_v18 }
  0x54   :  { %91 = vst.msk [vmem:[#allocation4 + $0x4] sm:$0x1] %vm30_vm0, %v90_v19 }
  0x55 LB: > { %s100_s0 = sadd.s32 40, %s501_s14  ;;  %s97_s14 = sadd.s32 1, %s501_s14   ;;  %s501_s14 = sphi %s499_s14, %s97_s14   ;;  %v497_v20 = vphi %v495_v20, %v496_v20  }
  0x56   : > { %s101_s15 = sld [smem:[#allocation3 + %s100_s0]]  ;;  %p94_p10 = scmp.ge.s32.totalorder %s97_s14, 8  }
  0x57   :  { %v503_v24 = vmov (%p94_p10), 0.0   ;;  %s507_s19 = smov (%p94_p10), 0  }
  0x5a   :  { %96 = sbr.rel (!%p94_p10) target bundleno = 85 (0x55), region = 143 }
  0x5c   : > { %s102_s18 = scalar_lea.vmem %s584_s1, %s101_s15 }
  0x5d   : > { %v103_v21 = vld [vmem:[%s102_s18] sm:$0x1] }
  0x5e   : > { %v104_v22 = vadd.f32 %v497_v20, %v103_v21  }
  0x60   : > { %v496_v20 = vmov %v104_v22   ;;  %v105_v23 = vmul.f32 (%p94_p10), 0.125, %v104_v22 }
  0x62   :  { %106 = vst.msk [vmem:[#allocation4 + $0x5] sm:$0x1] %vm30_vm0, %v105_v23 }
  0x63 LB: > { %s115_s20 = sadd.s32 48, %s509_s19  ;;  %s112_s19 = sadd.s32 1, %s509_s19   ;;  %s509_s19 = sphi %s507_s19, %s112_s19   ;;  %v505_v24 = vphi %v503_v24, %v504_v24  }
  0x64   : > { %s116_s21 = sld [smem:[#allocation3 + %s115_s20]]  ;;  %p109_p11 = scmp.ge.s32.totalorder %s112_s19, 8  }
  0x65   :  { %v511_v28 = vmov (%p109_p11), 0.0   ;;  %s515_s25 = smov (%p109_p11), 0  }
  0x68   :  { %111 = sbr.rel (!%p109_p11) target bundleno = 99 (0x63), region = 154 }
  0x6a   : > { %s117_s24 = scalar_lea.vmem %s584_s1, %s116_s21 }
  0x6b   : > { %v118_v25 = vld [vmem:[%s117_s24] sm:$0x1] }
  0x6c   : > { %v119_v26 = vadd.f32 %v505_v24, %v118_v25  }
  0x6e   : > { %v504_v24 = vmov %v119_v26   ;;  %v120_v27 = vmul.f32 (%p109_p11), 0.125, %v119_v26 }
  0x70   :  { %121 = vst.msk [vmem:[#allocation4 + $0x6] sm:$0x1] %vm30_vm0, %v120_v27 }
  0x71 LB: > { %s130_s26 = sadd.s32 56, %s517_s25  ;;  %s127_s25 = sadd.s32 1, %s517_s25   ;;  %s517_s25 = sphi %s515_s25, %s127_s25   ;;  %v513_v28 = vphi %v511_v28, %v512_v28  }
  0x72   : > { %s131_s27 = sld [smem:[#allocation3 + %s130_s26]]  ;;  %p124_p12 = scmp.ge.s32.totalorder %s127_s25, 8  }
  0x73   :  { %s520_s3 = smov (%p124_p12), [#allocation4]  }
  0x74   :  { %s143_s4 = sshll.u32 (%p124_p12), %s520_s3, 4  ;;  %s144_s4 = int_to_ptr.vmem [resolvable:$true] %s143_s4 }
  0x75   :  { %s365_s5 = scalar_lea.vmem (%p124_p12), %s144_s4, 128  ;;  %p370_p0 = scmp.lt.s32.totalorder (%p124_p12), %s144_s4, %s144_s4 }
  0x76   :  { %126 = sbr.rel (!%p124_p12) target bundleno = 113 (0x71), region = 165  ;;  %p366_p13 = scmp.ne.s32.totalorder (%p124_p12), %s144_s4, %s365_s5 }
  0x77   :  { %p371_p1 = scmp.lt.s32.totalorder (%p124_p12), %s365_s5, %s365_s5 }
  0x78   : > { %s132_s30 = scalar_lea.vmem %s584_s1, %s131_s27 }
  0x79   : > { %v133_v29 = vld [vmem:[%s132_s30] sm:$0x1]  ;;  %p372_p2 = por (%p124_p12), %p371_p1, %p370_p0 }
  0x7a   : > { %v134_v30 = vadd.f32 %v513_v28, %v133_v29  }
  0x7b   :  { %p373_p3 = pnand (%p124_p12), %p372_p2, %p366_p13 }
  0x7c   : > { %v512_v28 = vmov %v134_v30   ;;  %v135_v31 = vmul.f32 (%p124_p12), 0.125, %v134_v30 }
  0x7e   :  { %136 = vst.msk [vmem:[#allocation4 + $0x7] sm:$0x1] %vm30_vm0, %v135_v31 }
  0x7f   :  { %376 = shalt.err (!%p373_p3)
}
  0x80   :  { %s377_s8 = scalar_lea.hbm %s585_s2, 128 }
  0x81   :  { %p378_p4 = scmp.ne.s32.totalorder %s585_s2, %s377_s8  ;;  %p381_p5 = scmp.lt.u32.totalorder %s377_s8, %s585_s2 }
  0x83   :  { %p383_p6 = pnand %p381_p5, %p378_p4 }
  0x85   :  { %386 = shalt.err (!%p383_p6)
}
  0x86   :  { %146 = dma.vmem_to_hbm [thread:$0]  %s144_s4, 128, %s585_s2, [#allocation5]  }
  0x87   :  { %453 = dma.done.wait [#allocation5], 128  }
  0x88   :  { %454 = vsyncadd [#allocation5], 4294967168 }
  0x89   :  { %150 = vsyncpa [#allocation5], 1 }

</bundles_post_ra>
